<compile_context>
chip_gen: v7x
topology: tpu7x:2x2x1
jax: 0.10.0
libtpu: 0.0.40
codegen_flags: <defaults>
</compile_context>

<pallas_src>
import jax
import jax.numpy as jnp
from jax.experimental import pallas as pl
from jax.experimental.pallas import tpu as pltpu

SUBLANE = 8


def _round_up(x: int, m: int) -> int:
    return ((x + m - 1) // m) * m


# ----------------------------------------------------------------------------
# Kernels
# ----------------------------------------------------------------------------

def _critic_kernel_l1(x_ref, w1_ref, b1_ref, w2_ref, b2_ref, o_ref):
    # x:  [TB, F]  (input dtype)     w1: [F, H] (compute dtype)
    # b1: [1, H]   f32               w2: [1, H] (compute dtype)
    # b2: [1, 1]   f32               o:  [TB, 1] f32
    x = x_ref[...].astype(w1_ref.dtype)                         # VPU cast (no-op for f32)
    h = jnp.dot(x, w1_ref[...], preferred_element_type=jnp.float32)   # MXU, f32 acc
    h = jnp.maximum(h + b1_ref[...], 0.0)                       # f32 bias + ReLU (VPU)
    # Degenerate N=1 second matmul -> VPU multiply + XLU lane reduce; MXU stays free.
    w2_row = w2_ref[...].astype(jnp.float32)                    # [1, H]
    out = jnp.sum(h * w2_row, axis=-1, keepdims=True) + b2_ref[...]
    o_ref[...] = out.astype(o_ref.dtype)


def _critic_kernel_general(x_ref, w1_ref, b1_ref, w2_ref, b2_ref, o_ref):
    # General last_size > 1: second projection stays on the MXU.
    x = x_ref[...].astype(w1_ref.dtype)
    h = jnp.dot(x, w1_ref[...], preferred_element_type=jnp.float32)
    h = jnp.maximum(h + b1_ref[...], 0.0)
    out = jnp.dot(h.astype(w2_ref.dtype), w2_ref[...],
                  preferred_element_type=jnp.float32) + b2_ref[...]
    o_ref[...] = out.astype(o_ref.dtype)


# ----------------------------------------------------------------------------
# One-time parameter conversion (out of the hot path)
# ----------------------------------------------------------------------------

def convert_params(w1, b1, w2, b2, compute_dtype=jnp.float32):
    """Convert PyTorch-layout params (w: [out, in], b: [out]) to kernel layout.

    Transposes to [in, out] ONCE. Weights are stored in `compute_dtype`
    (jnp.bfloat16 on v6e/v7x for ~2x MXU throughput and half the HBM/VMEM
    bytes); biases stay f32 (added after f32 accumulation). No HBM padding:
    full-extent BlockSpecs let the compiler handle vreg lane layout.
    """
    w1 = jnp.asarray(w1)
    b1 = jnp.asarray(b1)
    w2 = jnp.asarray(w2)
    b2 = jnp.asarray(b2)
    H, F = w1.shape
    L = w2.shape[0]

    w1_k = w1.T.astype(compute_dtype)                       # [F, H]
    b1_k = b1.astype(jnp.float32).reshape(1, H)              # [1, H] f32

    if L == 1:
        w2_k = w2.astype(compute_dtype).reshape(1, H)         # [1, H]
        b2_k = b2.astype(jnp.float32).reshape(1, 1)
    else:
        w2_k = w2.T.astype(compute_dtype)                     # [H, L]
        b2_k = b2.astype(jnp.float32).reshape(1, L)

    return {"w1": w1_k, "b1": b1_k, "w2": w2_k, "b2": b2_k,
            "F": F, "H": H, "L": L}


# ----------------------------------------------------------------------------
# Forward wrapper
# ----------------------------------------------------------------------------

def mlp_critic_forward(feat, params, *, block_b=256, vmem_limit_bytes=None):
    """feat: [B, F]. params: output of convert_params.

    Returns [B] if last_size == 1 (squeeze(-1) semantics), else [B, L].
    block_b: batch tile (rounded up to a multiple of 8). Per-step working set is
    ~2*TB*F + F*H (+ H*L) elements, which is far under VMEM at any sane size;
    raise vmem_limit_bytes only for extreme (block_b, F, H) combinations.
    """
    F, H, L = params["F"], params["H"], params["L"]
    w1, b1, w2, b2 = params["w1"], params["b1"], params["w2"], params["b2"]

    feat = jnp.asarray(feat)
    B, Fin = feat.shape
    assert Fin == F, f"feature dim mismatch: {Fin} vs {F}"

    TB = _round_up(min(block_b, B), SUBLANE)
    n_tiles = pl.cdiv(B, TB)        # final partial tile handled by Pallas clipping

    if L == 1:
        kernel = _critic_kernel_l1
        l_out = 1
    else:
        kernel = _critic_kernel_general
        l_out = L

    out = pl.pallas_call(
        kernel,
        out_shape=jax.ShapeDtypeStruct((B, l_out), jnp.float32),
        grid=(n_tiles,),
        in_specs=[
            pl.BlockSpec((TB, F), lambda i: (i, 0)),       # x: tiled over batch
            pl.BlockSpec((F, H), lambda i: (0, 0)),        # w1: VMEM-resident
            pl.BlockSpec((1, H), lambda i: (0, 0)),        # b1
            pl.BlockSpec(w2.shape, lambda i: (0, 0)),      # w2
            pl.BlockSpec(b2.shape, lambda i: (0, 0)),      # b2
        ],
        out_specs=pl.BlockSpec((TB, l_out), lambda i: (i, 0)),
        compiler_params=pltpu.CompilerParams(
            dimension_semantics=("parallel",),
            vmem_limit_bytes=vmem_limit_bytes,
        ),
    )(feat, w1, b1, w2, b2)

    if L == 1:
        return out.reshape(B)                              # squeeze(dim=-1)
    return out


# ----------------------------------------------------------------------------
# Init (mimics torch.nn.Linear default: U[-1/sqrt(fan_in), +1/sqrt(fan_in)])
# ----------------------------------------------------------------------------

def init_params(key, feat_shape, hidden_shape, last_size=1):
    k1, k2, k3, k4 = jax.random.split(key, 4)
    bound1 = 1.0 / jnp.sqrt(feat_shape)
    bound2 = 1.0 / jnp.sqrt(hidden_shape)
    w1 = jax.random.uniform(k1, (hidden_shape, feat_shape), jnp.float32, -bound1, bound1)
    b1 = jax.random.uniform(k2, (hidden_shape,), jnp.float32, -bound1, bound1)
    w2 = jax.random.uniform(k3, (last_size, hidden_shape), jnp.float32, -bound2, bound2)
    b2 = jax.random.uniform(k4, (last_size,), jnp.float32, -bound2, bound2)
    return w1, b1, w2, b2


if __name__ == "__main__":
    # CartPole-style shapes (kept small): feat=4, hidden=32; batch=20 so the
    # batch grid has multiple tiles plus a partial final tile with block_b=8.
    batch, feat_shape, hidden_shape = 20, 4, 32

    key = jax.random.PRNGKey(0)
    k_in, k_params = jax.random.split(key)
    feat = jax.random.normal(k_in, (batch, feat_shape), jnp.float32)
    w1, b1, w2, b2 = init_params(k_params, feat_shape, hidden_shape, last_size=1)

    # Pure-JAX reference (PyTorch semantics).
    h_ref = jnp.maximum(feat @ w1.T + b1, 0.0)
    ref1 = (h_ref @ w2.T + b2).reshape(batch)

    # 1) f32 path, last_size=1 (VPU epilogue), tiled batch grid (grid=(3,), partial tile).
    params_f32 = convert_params(w1, b1, w2, b2, compute_dtype=jnp.float32)
    out = jax.block_until_ready(mlp_critic_forward(feat, params_f32, block_b=8))
    assert out.shape == (batch,)
    assert jnp.allclose(out, ref1, atol=1e-4, rtol=1e-4)

    # 2) bf16 MXU-input path (v6e/v7x option), f32 accumulation + f32 epilogue.
    params_bf16 = convert_params(w1, b1, w2, b2, compute_dtype=jnp.bfloat16)
    out_bf16 = jax.block_until_ready(mlp_critic_forward(feat, params_bf16, block_b=8))
    assert out_bf16.shape == (batch,)
    assert jnp.allclose(out_bf16, ref1, atol=5e-2, rtol=5e-2)

    # 3) last_size > 1 path (squeeze(-1) is a no-op, MXU second matmul).
    w1b, b1b, w2b, b2b = init_params(k_params, feat_shape, hidden_shape, last_size=3)
    ref3 = jnp.maximum(feat @ w1b.T + b1b, 0.0) @ w2b.T + b2b
    params3 = convert_params(w1b, b1b, w2b, b2b, compute_dtype=jnp.float32)
    out3 = jax.block_until_ready(mlp_critic_forward(feat, params3, block_b=8))
    assert out3.shape == (batch, 3)
    assert jnp.allclose(out3, ref3, atol=1e-4, rtol=1e-4)

    # 4) Default large batch tile path (single tile covering the whole batch).
    out_def = jax.block_until_ready(mlp_critic_forward(feat, params_f32))
    assert jnp.allclose(out_def, ref1, atol=1e-4, rtol=1e-4)

    print("KERNEL_OK")
</pallas_src>

<mosaic_0001>
module attributes {stable_mosaic.version = 11 : i64} {
  func.func @_critic_kernel_l1(%arg0: i32, %arg1: memref<8x4xf32, #tpu.memory_space<vmem>>, %arg2: memref<4x32xf32, #tpu.memory_space<vmem>>, %arg3: memref<1x32xf32, #tpu.memory_space<vmem>>, %arg4: memref<1x32xf32, #tpu.memory_space<vmem>>, %arg5: memref<1x1xf32, #tpu.memory_space<vmem>>, %arg6: memref<8x1xf32, #tpu.memory_space<vmem>>) attributes {dimension_semantics = [#tpu.dimension_semantics<parallel>], iteration_bounds = array<i64: 3>, scalar_prefetch = 0 : i64, scratch_operands = 0 : i64, tpu.core_type = #tpu.core_type<tc>, window_params = [{transform_indices = @transform_0, window_bounds = array<i64: 8, 4>}, {pipeline_mode = #tpu.pipeline_mode<synchronous>, transform_indices = @transform_1, window_bounds = array<i64: 4, 32>}, {pipeline_mode = #tpu.pipeline_mode<synchronous>, transform_indices = @transform_2, window_bounds = array<i64: 1, 32>}, {pipeline_mode = #tpu.pipeline_mode<synchronous>, transform_indices = @transform_3, window_bounds = array<i64: 1, 32>}, {pipeline_mode = #tpu.pipeline_mode<synchronous>, transform_indices = @transform_4, window_bounds = array<i64: 1, 1>}, {transform_indices = @transform_5, window_bounds = array<i64: 8, 1>}]} {
    %c0 = arith.constant 0 : index
    %c0_0 = arith.constant 0 : index
    %0 = vector.load %arg1[%c0, %c0_0] : memref<8x4xf32, #tpu.memory_space<vmem>>, vector<8x4xf32>
    %c0_1 = arith.constant 0 : index
    %c0_2 = arith.constant 0 : index
    %1 = vector.load %arg2[%c0_1, %c0_2] : memref<4x32xf32, #tpu.memory_space<vmem>>, vector<4x32xf32>
    %cst = arith.constant dense<0.000000e+00> : vector<8x32xf32>
    %2 = tpu.matmul %0, %1, %cst {dimension_numbers = #tpu.dot_dimension_numbers<[1], [0], [0], [1], [0, 0, 1, 1], [], []>} : vector<8x4xf32>, vector<4x32xf32>, vector<8x32xf32> -> vector<8x32xf32>
    %c0_3 = arith.constant 0 : index
    %c0_4 = arith.constant 0 : index
    %3 = vector.load %arg3[%c0_3, %c0_4] : memref<1x32xf32, #tpu.memory_space<vmem>>, vector<1x32xf32>
    %4 = vector.broadcast %3 : vector<1x32xf32> to vector<8x32xf32>
    %5 = arith.addf %2, %4 : vector<8x32xf32>
    %cst_5 = arith.constant 0.000000e+00 : f32
    %6 = vector.broadcast %cst_5 : f32 to vector<8x32xf32>
    %7 = arith.maximumf %5, %6 : vector<8x32xf32>
    %c0_6 = arith.constant 0 : index
    %c0_7 = arith.constant 0 : index
    %8 = vector.load %arg4[%c0_6, %c0_7] : memref<1x32xf32, #tpu.memory_space<vmem>>, vector<1x32xf32>
    %9 = vector.broadcast %8 : vector<1x32xf32> to vector<8x32xf32>
    %10 = arith.mulf %7, %9 : vector<8x32xf32>
    %cst_8 = arith.constant dense<0.000000e+00> : vector<8xf32>
    %11 = vector.multi_reduction <add>, %10, %cst_8 [1] : vector<8x32xf32> to vector<8xf32>
    %12 = vector.shape_cast %11 : vector<8xf32> to vector<8x1xf32>
    %c0_9 = arith.constant 0 : index
    %c0_10 = arith.constant 0 : index
    %13 = vector.load %arg5[%c0_9, %c0_10] : memref<1x1xf32, #tpu.memory_space<vmem>>, vector<1x1xf32>
    %14 = vector.broadcast %13 : vector<1x1xf32> to vector<8x1xf32>
    %15 = arith.addf %12, %14 : vector<8x1xf32>
    %c0_11 = arith.constant 0 : index
    %c0_12 = arith.constant 0 : index
    %16 = vector.load %arg6[%c0_11, %c0_12] : memref<8x1xf32, #tpu.memory_space<vmem>>, vector<8x1xf32>
    tpu.vector_store %arg6[%c0_11, %c0_12], %15 {strides = array<i32>} : memref<8x1xf32, #tpu.memory_space<vmem>>, vector<8x1xf32>,
    return
  }
  func.func @transform_0(%arg0: i32) -> (i32, i32) {
    %c0_i32 = arith.constant 0 : i32
    %c0_i32_0 = arith.constant 0 : i32
    return %arg0, %c0_i32 : i32, i32
  }
  func.func @transform_1(%arg0: i32) -> (i32, i32) {
    %c0_i32 = arith.constant 0 : i32
    %c0_i32_0 = arith.constant 0 : i32
    %c0_i32_1 = arith.constant 0 : i32
    return %c0_i32, %c0_i32_0 : i32, i32
  }
  func.func @transform_2(%arg0: i32) -> (i32, i32) {
    %c0_i32 = arith.constant 0 : i32
    %c0_i32_0 = arith.constant 0 : i32
    %c0_i32_1 = arith.constant 0 : i32
    return %c0_i32, %c0_i32_0 : i32, i32
  }
  func.func @transform_3(%arg0: i32) -> (i32, i32) {
    %c0_i32 = arith.constant 0 : i32
    %c0_i32_0 = arith.constant 0 : i32
    %c0_i32_1 = arith.constant 0 : i32
    return %c0_i32, %c0_i32_0 : i32, i32
  }
  func.func @transform_4(%arg0: i32) -> (i32, i32) {
    %c0_i32 = arith.constant 0 : i32
    %c0_i32_0 = arith.constant 0 : i32
    %c0_i32_1 = arith.constant 0 : i32
    return %c0_i32, %c0_i32_0 : i32, i32
  }
  func.func @transform_5(%arg0: i32) -> (i32, i32) {
    %c0_i32 = arith.constant 0 : i32
    %c0_i32_0 = arith.constant 0 : i32
    return %arg0, %c0_i32 : i32, i32
  }
}

</mosaic_0001>

<bundles_post_ra>
// kernel: tpu_custom_call.1
= control target key start
LH: loop header
LB: loop body
LE: loop exit
PB: predicated region body
PF: predicated region fallthrough
CT: control target
= control target key end

     0   :  { %s459_s20 = smov 0   ;;  %s485_s0 = inlined_call_operand.vmem [shape: f32[20,4], index: 0, kind: input, shape index: {}]   ;;  %s486_s1 = inlined_call_operand.vmem [shape: f32[4,32], index: 1, kind: input, shape index: {}]   ;;  %s487_s2 = inlined_call_operand.vmem [shape: f32[1,32], index: 2, kind: input, shape index: {}]   ;;  %s488_s3 = inlined_call_operand.vmem [shape: f32[1,32], index: 3, kind: input, shape index: {}]   ;;  %s489_s4 = inlined_call_operand.<no memory space> [shape: f32[1,1], index: 4, kind: input, shape index: {}]   ;;  %s490_s5 = inlined_call_operand.vmem [shape: f32[20,1], index: 5, kind: output, shape index: {}]  }
   0x1   :  { %v10_v0 = vstv %s489_s4 }
   0x2   :  { %11 = vst [vmem:[#allocation2] sm:$0x1] %v10_v0 }
   0x3 LB: > { %s385_s21 = sadd.s32 4294967295, %s422_s20   ;;  %p389_p0 = scmp.ge.s32.totalorder %s422_s20, 1  ;;  %s422_s20 = sphi %s459_s20, %s17_s20  }
   0x4   : > { %p188_p1 = scmp.lt.s32.totalorder %s422_s20, 4 }
   0x6   : > { %p189_p2 = pnand %p389_p0, %p188_p1 }
   0x7   : > { %v223_v1 = vld [vmem:[%s486_s1] sm:$0xf] (!%p189_p2)  ;;  %vm235_vm0 = vcmask (!%p189_p2), 1043456   ;;  %p214_p3 = scmp.lt.s32.totalorder (!%p189_p2), %s385_s21, 2  ;;  %v424_v2 = vmov (!%p189_p2), 0.0   ;;  %vm425_vm1 = vmmov (!%p189_p2), 0  }
   0x8   : > { %192 = sbr.rel (%p189_p2) target bundleno = 383 (0x17f), region = 40  ;;  %401 = vmatprep.subr.mxu0 (!%p189_p2), %v424_v2  ;;  %403 = vmatprep.mubr.msk.f32.mxu0 (!%p189_p2), %vm425_vm1, %v424_v2  ;;  %vm231_vm2 = vcmask (!%p189_p2), 31744   ;;  %v392_v4 = vld [vmem:[%s487_s2] ss:$0 sm:$0xff] (!%p189_p2)  ;;  %vm318_vm3 = vcmask (!%p189_p2), 261120   ;;  %vm330_vm4 = vcmask (!%p189_p2), 7168  }
   0x9   : > { %402 = vmatpush3.msk.msra.mxu0 (!%p189_p2), %vm235_vm0, %v223_v1  ;;  %v395_v8 = vld [vmem:[%s488_s3] ss:$0 sm:$0xff] (!%p189_p2) }
   0xa   : > { %v396_v12 = vld [vmem:[#allocation2] ss:$0 sm:$0xff] (!%p189_p2) }
   0xf   : > { %s492_s21 = smov (!%p214_p3, %s385_s21), 2 }
  0x10   : > { %s390_s4 = sshll.u32 %s492_s21, 3 }
  0x11   : > { %s217_s26 = scalar_lea.vmem %s485_s0, %s390_s4  ;;  %s221_s8 = scalar_lea.vmem %s490_s5, %s390_s4 }
  0x12   : > { %v222_v3 = vld [vmem:[%s217_s26] sm:$0xff] }
  0x13   : > { %404 = vmatmul.mubr.msk.f32.vlgmr.msra.gmra.mrb[0].mxu0 %vm231_vm2, %v222_v3 }
  0xe6   : > { %v305_v5 = vpop.f32.mrb[0].mxu0 }
  0xe7   : > { %v306_v6 = vadd.f32 %v392_v4, %v305_v5  ;;  %v405_v7 = vpop.f32.mrb[1].mxu0 }
  0xe9   : > { %v309_v9 = vmax.f32 %v306_v6, 0.0 }
  0xeb   : > { %v317_v10 = vmul.f32 %v395_v8, %v309_v9 }
  0xed   : > { %v319_v11 = vsel %vm318_vm3, %v317_v10, 0.0 }
  0xee   : > { %320 = vadd.xlane.f32.xlu0 %v319_v11 }
 0x17b   : > { %v321_v13 = vpop.xlane.xlu0 %320 }
 0x17c   : > { %v329_v14 = vadd.f32 %v396_v12, %v321_v13 }
 0x17e   : > { %331 = vst.msk [vmem:[%s221_s8] sm:$0xff] %vm330_vm4, %v329_v14 }
 0x17f PF: > { %s17_s20 = sadd.s32 1, %s422_s20  }
 0x180   : > { %p14_p4 = scmp.ge.s32.totalorder %s17_s20, 5  }
 0x182   :  { %16 = sbr.rel (!%p14_p4) target bundleno = 3 (0x3), region = 70 }

</bundles_post_ra>
